<compile_context>
chip_gen: v6e
topology: v6e:2x2x1
jax: 0.10.0
libtpu: 0.0.40
codegen_flags: <defaults>
</compile_context>

<pallas_src>
import functools

import jax
import jax.numpy as jnp
from jax import lax
from jax.experimental import pallas as pl
from jax.experimental.pallas import tpu as pltpu

_EPS = 1e-5
_VMEM_LIMIT = 32 * 1024 * 1024  # explicit scoped-VMEM budget (safe on v5e/v6e/v7x)


# --------------------------------------------------------------------------
# banded conv weights: fold KW taps + horizontal zero padding + stride into a
# (KH, W_in*Cin, W_out*Cout) matrix so each vertical tap is ONE MXU matmul.
# --------------------------------------------------------------------------
def _band_weights(w, w_in, w_out, stride, pad):
    kh, kw, cin, cout = w.shape
    j = jnp.arange(w_in)                                  # input column
    wo = jnp.arange(w_out)                                # output column
    dx = j[:, None] - wo[None, :] * stride + pad          # (w_in, w_out) tap index
    valid = (dx >= 0) & (dx < kw)
    dxc = jnp.clip(dx, 0, kw - 1)
    g = w[:, dxc]                                         # (KH, w_in, w_out, Cin, Cout)
    g = g * valid[None, :, :, None, None].astype(w.dtype)
    return g.transpose(0, 1, 3, 2, 4).reshape(kh, w_in * cin, w_out * cout)


# --------------------------------------------------------------------------
# kernels
# --------------------------------------------------------------------------
def _conv1_stats_kernel(x_ref, wb_ref, y_ref, st_ref, *, kh, stride, th):
    """conv1 (banded MXU matmuls) for one row tile + BN1 sum/sumsq partials."""
    r = pl.program_id(1)

    @pl.when(r == 0)
    def _():
        st_ref[...] = jnp.zeros_like(st_ref)

    acc = jnp.zeros(y_ref.shape, jnp.float32)             # (Th, Wo*Cout) f32 accumulator
    row0 = r * th * stride
    if (th * stride) % 8 == 0:
        row0 = pl.multiple_of(row0, 8)
    for dy in range(kh):                                  # KH lane-dense matmuls, K = W*Cin
        if stride == 1:
            rows = x_ref[pl.ds(row0 + dy, th), :]
        else:
            rows = x_ref[pl.ds(row0 + dy, th, stride=stride), :]
        acc = acc + jnp.dot(rows.astype(jnp.bfloat16), wb_ref[dy],
                            preferred_element_type=jnp.float32)
    y_ref[...] = acc
    ssum = jnp.sum(acc, axis=0, keepdims=True)
    ssq = jnp.sum(acc * acc, axis=0, keepdims=True)
    st_ref[...] = st_ref[...] + jnp.concatenate([ssum, ssq], axis=0)


def _bn1_conv2_stats_kernel(y1_ref, sc_ref, bi_ref, wb_ref, y2_ref, st_ref,
                            ypad_ref, *, kh, th, pad):
    """BN1(scale/bias FMA)+ReLU into a zero-padded VMEM slab (no HBM round
    trip), then conv2 for one row tile + BN2 sum/sumsq partials."""
    r = pl.program_id(1)

    @pl.when(r == 0)
    def _():
        st_ref[...] = jnp.zeros_like(st_ref)
        ypad_ref[...] = jnp.zeros_like(ypad_ref)          # zero halo rows
        yn = jnp.maximum(y1_ref[...] * sc_ref[...] + bi_ref[...], 0.0)
        ypad_ref[pad:pad + yn.shape[0], :] = yn

    acc = jnp.zeros(y2_ref.shape, jnp.float32)
    row0 = r * th
    if th % 8 == 0:
        row0 = pl.multiple_of(row0, 8)
    for dy in range(kh):
        rows = ypad_ref[pl.ds(row0 + dy, th), :]
        acc = acc + jnp.dot(rows.astype(jnp.bfloat16), wb_ref[dy],
                            preferred_element_type=jnp.float32)
    y2_ref[...] = acc
    ssum = jnp.sum(acc, axis=0, keepdims=True)
    ssq = jnp.sum(acc * acc, axis=0, keepdims=True)
    st_ref[...] = st_ref[...] + jnp.concatenate([ssum, ssq], axis=0)


def _bn2_add_relu_kernel(y2_ref, sc_ref, bi_ref, x_ref, o_ref, *, th, pad):
    """BN2 + identity shortcut + ReLU for one row tile."""
    r = pl.program_id(1)
    yn = y2_ref[...] * sc_ref[...] + bi_ref[...]
    base = r * th
    if th % 8 == 0:
        base = pl.multiple_of(base, 8)
    rows = x_ref[pl.ds(base + pad, th), :]                # skip the padded top rows
    o_ref[...] = jnp.maximum(yn + rows, 0.0)


def _bn2_proj_add_relu_kernel(y2_ref, sc_ref, bi_ref, x_ref, w3_ref, b3_ref,
                              o_ref, *, th, stride, pad):
    """BN2 + (1x1-conv, stride) shortcut + ReLU for one row tile."""
    r = pl.program_id(1)
    yn = y2_ref[...] * sc_ref[...] + bi_ref[...]
    base = r * th * stride
    if (th * stride) % 8 == 0:
        base = pl.multiple_of(base, 8)
    if stride == 1:
        rows = x_ref[pl.ds(base + pad, th), :]
    else:
        rows = x_ref[pl.ds(base + pad, th, stride=stride), :]
    short = jnp.dot(rows.astype(jnp.bfloat16), w3_ref[...],
                    preferred_element_type=jnp.float32) + b3_ref[...]
    o_ref[...] = jnp.maximum(yn + short, 0.0)


# --------------------------------------------------------------------------
# wrapper
# --------------------------------------------------------------------------
def _fold_bn(stats, count, w_out, cout, gamma, beta, eps):
    """Tiny O(C) glue: per-image sum/sumsq partials -> folded scale/bias slabs."""
    s = jnp.sum(stats.astype(jnp.float32), axis=0)        # (2, Wo*Cout)
    csum = s[0].reshape(w_out, cout).sum(axis=0)
    csq = s[1].reshape(w_out, cout).sum(axis=0)
    mean = csum / count
    var = csq / count - mean * mean                       # biased var (PyTorch training BN)
    scale = gamma * lax.rsqrt(var + eps)
    bias = beta - mean * scale
    return (jnp.tile(scale, w_out)[None, :].astype(jnp.float32),
            jnp.tile(bias, w_out)[None, :].astype(jnp.float32))


def residual_forward(x_nchw, params, *, stride=1, use_1x1_conv=False, eps=_EPS):
    """Forward of the PyTorch `residual` module. Input/output are NCHW."""
    N, Cin, H, W = x_nchw.shape
    w1 = params["w1"]
    KH, KW, _, Cout = w1.shape
    pad = (KH - 1) // 2
    Ho = (H + 2 * pad - KH) // stride + 1
    Wo = (W + 2 * pad - KW) // stride + 1
    if not use_1x1_conv and (stride != 1 or Cin != Cout):
        raise ValueError("identity shortcut requires stride=1 and Cin==Cout "
                         "(same constraint as the PyTorch module)")

    K1 = Wo * Cout
    Th = 8 if Ho % 8 == 0 else Ho                         # output-row tile
    R = Ho // Th
    cnt = float(N * Ho * Wo)
    Hp = H + 2 * pad

    # NCHW -> lane-dense slab (N, H, W*Cin); only vertical zero padding here
    # (horizontal padding + stride live inside the banded weights).
    x_slab = jnp.transpose(x_nchw, (0, 2, 3, 1)).reshape(N, H, W * Cin)
    x_rp = jnp.pad(x_slab, ((0, 0), (pad, pad), (0, 0))).astype(jnp.float32)

    w1b = _band_weights(w1, W, Wo, stride, pad).astype(jnp.bfloat16)          # (KH, W*Cin, K1)
    w2b = _band_weights(params["w2"], Wo, Wo, 1, pad).astype(jnp.bfloat16)    # (KH, K1, K1)

    par_arb = pltpu.CompilerParams(dimension_semantics=("parallel", "arbitrary"),
                                   vmem_limit_bytes=_VMEM_LIMIT)
    par_par = pltpu.CompilerParams(dimension_semantics=("parallel", "parallel"),
                                   vmem_limit_bytes=_VMEM_LIMIT)

    def _bytes(*arrs):
        return int(sum(a.size * a.dtype.itemsize for a in arrs))

    # -------- call 1: conv1 + BN1 partial stats (sum / sumsq) --------
    y1_raw, st1 = pl.pallas_call(
        functools.partial(_conv1_stats_kernel, kh=KH, stride=stride, th=Th),
        grid=(N, R),
        in_specs=[pl.BlockSpec((None, Hp, W * Cin), lambda n, r: (n, 0, 0)),
                  pl.BlockSpec((KH, W * Cin, K1), lambda n, r: (0, 0, 0))],
        out_specs=[pl.BlockSpec((None, Th, K1), lambda n, r: (n, r, 0)),
                   pl.BlockSpec((None, 2, K1), lambda n, r: (n, 0, 0))],
        out_shape=[jax.ShapeDtypeStruct((N, Ho, K1), jnp.float32),
                   jax.ShapeDtypeStruct((N, 2, K1), jnp.float32)],
        compiler_params=par_arb,
        cost_estimate=pl.CostEstimate(
            flops=2 * N * Ho * (W * Cin) * K1 * KH, transcendentals=0,
            bytes_accessed=_bytes(x_rp, w1b) + 4 * N * (Ho + 2) * K1),
    )(x_rp, w1b)

    sc1, bi1 = _fold_bn(st1, cnt, Wo, Cout, params["g1"], params["be1"], eps)

    # -------- call 2: BN1+ReLU (VMEM) -> conv2 + BN2 partial stats --------
    y2_raw, st2 = pl.pallas_call(
        functools.partial(_bn1_conv2_stats_kernel, kh=KH, th=Th, pad=pad),
        grid=(N, R),
        in_specs=[pl.BlockSpec((None, Ho, K1), lambda n, r: (n, 0, 0)),
                  pl.BlockSpec((1, K1), lambda n, r: (0, 0)),
                  pl.BlockSpec((1, K1), lambda n, r: (0, 0)),
                  pl.BlockSpec((KH, K1, K1), lambda n, r: (0, 0, 0))],
        out_specs=[pl.BlockSpec((None, Th, K1), lambda n, r: (n, r, 0)),
                   pl.BlockSpec((None, 2, K1), lambda n, r: (n, 0, 0))],
        out_shape=[jax.ShapeDtypeStruct((N, Ho, K1), jnp.float32),
                   jax.ShapeDtypeStruct((N, 2, K1), jnp.float32)],
        scratch_shapes=[pltpu.VMEM((Ho + 2 * pad, K1), jnp.float32)],
        compiler_params=par_arb,
        cost_estimate=pl.CostEstimate(
            flops=2 * N * Ho * K1 * K1 * KH, transcendentals=0,
            bytes_accessed=_bytes(y1_raw, w2b) + 4 * N * (Ho + 2) * K1),
    )(y1_raw, sc1, bi1, w2b)

    sc2, bi2 = _fold_bn(st2, cnt, Wo, Cout, params["g2"], params["be2"], eps)

    # -------- call 3: BN2 + shortcut + ReLU --------
    y2_spec = pl.BlockSpec((None, Th, K1), lambda n, r: (n, r, 0))
    vec_spec = pl.BlockSpec((1, K1), lambda n, r: (0, 0))
    x_spec = pl.BlockSpec((None, Hp, W * Cin), lambda n, r: (n, 0, 0))
    o_spec = pl.BlockSpec((None, Th, K1), lambda n, r: (n, r, 0))
    out_shape = jax.ShapeDtypeStruct((N, Ho, K1), jnp.float32)

    if use_1x1_conv:
        w3 = params["w3"].reshape(1, 1, Cin, Cout)
        w3b = _band_weights(w3, W, Wo, stride, 0)[0].astype(jnp.bfloat16)     # (W*Cin, K1)
        b3s = jnp.tile(params["b3"], Wo)[None, :].astype(jnp.float32)         # (1, K1)
        out = pl.pallas_call(
            functools.partial(_bn2_proj_add_relu_kernel, th=Th, stride=stride, pad=pad),
            grid=(N, R),
            in_specs=[y2_spec, vec_spec, vec_spec, x_spec,
                      pl.BlockSpec((W * Cin, K1), lambda n, r: (0, 0)),
                      pl.BlockSpec((1, K1), lambda n, r: (0, 0))],
            out_specs=o_spec,
            out_shape=out_shape,
            compiler_params=par_par,
            cost_estimate=pl.CostEstimate(
                flops=2 * N * Ho * (W * Cin) * K1 + 4 * N * Ho * K1,
                transcendentals=0,
                bytes_accessed=_bytes(y2_raw, x_rp, w3b) + 4 * N * Ho * K1),
        )(y2_raw, sc2, bi2, x_rp, w3b, b3s)
    else:
        out = pl.pallas_call(
            functools.partial(_bn2_add_relu_kernel, th=Th, pad=pad),
            grid=(N, R),
            in_specs=[y2_spec, vec_spec, vec_spec, x_spec],
            out_specs=o_spec,
            out_shape=out_shape,
            compiler_params=par_par,
            cost_estimate=pl.CostEstimate(
                flops=4 * N * Ho * K1, transcendentals=0,
                bytes_accessed=_bytes(y2_raw, x_rp) + 4 * N * Ho * K1),
        )(y2_raw, sc2, bi2, x_rp)

    return jnp.transpose(out.reshape(N, Ho, Wo, Cout), (0, 3, 1, 2))          # -> NCHW


# ----------------------- deterministic parameter init -----------------------
def init_params(key, cin, cout, kernel_size=3, use_1x1_conv=False):
    k1, k2, k3 = jax.random.split(key, 3)

    def conv_init(k, kh, kw, ci, co):          # PyTorch-style uniform(-1/sqrt(fan_in), ...)
        bound = 1.0 / float(ci * kh * kw) ** 0.5
        kw_, kb = jax.random.split(k)
        w = jax.random.uniform(kw_, (kh, kw, ci, co), jnp.float32, -bound, bound)
        b = jax.random.uniform(kb, (co,), jnp.float32, -bound, bound)
        return w, b

    w1, b1 = conv_init(k1, kernel_size, kernel_size, cin, cout)
    w2, b2 = conv_init(k2, kernel_size, kernel_size, cout, cout)
    # b1/b2 exist for parity with the PyTorch module but cancel exactly under
    # training-mode BN, so the Pallas kernels never touch them.
    params = dict(w1=w1, b1=b1, g1=jnp.ones((cout,), jnp.float32),
                  be1=jnp.zeros((cout,), jnp.float32),
                  w2=w2, b2=b2, g2=jnp.ones((cout,), jnp.float32),
                  be2=jnp.zeros((cout,), jnp.float32))
    if use_1x1_conv:
        w3, b3 = conv_init(k3, 1, 1, cin, cout)
        params["w3"] = w3.reshape(cin, cout)
        params["b3"] = b3
    return params


# --------------------------- pure-JAX reference ------------------------------
def residual_reference(x_nchw, params, *, stride=1, use_1x1_conv=False, eps=_EPS):
    x = jnp.transpose(x_nchw, (0, 2, 3, 1)).astype(jnp.float32)
    KH = params["w1"].shape[0]
    pad = (KH - 1) // 2

    def conv(inp, w, b, s, p):
        y = lax.conv_general_dilated(inp, w, (s, s), [(p, p), (p, p)],
                                     dimension_numbers=("NHWC", "HWIO", "NHWC"))
        return y + b

    def bn(y, g, be):
        mean = jnp.mean(y, axis=(0, 1, 2), keepdims=True)
        var = jnp.mean((y - mean) ** 2, axis=(0, 1, 2), keepdims=True)
        return (y - mean) * lax.rsqrt(var + eps) * g + be

    y = jax.nn.relu(bn(conv(x, params["w1"], params["b1"], stride, pad),
                       params["g1"], params["be1"]))
    y = bn(conv(y, params["w2"], params["b2"], 1, pad), params["g2"], params["be2"])
    if use_1x1_conv:
        cin, cout = params["w3"].shape
        sc = conv(x, params["w3"].reshape(1, 1, cin, cout), params["b3"], stride, 0)
    else:
        sc = x
    return jnp.transpose(jax.nn.relu(y + sc), (0, 3, 1, 2))


def _check(name, out, ref):
    # tolerance sized for bf16 MXU operands through two chained 3x3 convs
    err = jnp.abs(out - ref)
    max_err = float(jnp.max(err))
    rel_l2 = float(jnp.linalg.norm(out - ref) / (jnp.linalg.norm(ref) + 1e-12))
    assert rel_l2 < 1e-2 and max_err < 5e-2, (
        f"{name} mismatch: rel_l2={rel_l2:.3e} max_abs={max_err:.3e}")


if __name__ == "__main__":
    key = jax.random.PRNGKey(0)
    kx, kp1, kp2 = jax.random.split(key, 3)

    # PyTorch-convention NCHW input.
    x = jax.random.normal(kx, (2, 4, 16, 16), jnp.float32)

    # Case 1: identity shortcut (input_channels == output_channels, stride=1).
    params1 = init_params(kp1, 4, 4, kernel_size=3, use_1x1_conv=False)
    fwd1 = jax.jit(functools.partial(residual_forward, stride=1, use_1x1_conv=False))
    out1 = fwd1(x, params1)
    jax.block_until_ready(out1)
    assert out1.shape == (2, 4, 16, 16)
    _check("case1", out1, residual_reference(x, params1, stride=1, use_1x1_conv=False))

    # Case 2: use_1x1_conv=True with a channel change (4 -> 8), stride=1.
    params2 = init_params(kp2, 4, 8, kernel_size=3, use_1x1_conv=True)
    fwd2 = jax.jit(functools.partial(residual_forward, stride=1, use_1x1_conv=True))
    out2 = fwd2(x, params2)
    jax.block_until_ready(out2)
    assert out2.shape == (2, 8, 16, 16)
    _check("case2", out2, residual_reference(x, params2, stride=1, use_1x1_conv=True))

    print("KERNEL_OK")
</pallas_src>

<mosaic_0001>
module attributes {stable_mosaic.version = 11 : i64} {
  func.func @_conv1_stats_kernel(%arg0: i32, %arg1: i32, %arg2: memref<1x18x64xf32, #tpu.memory_space<vmem>>, %arg3: memref<3x64x64xbf16, #tpu.memory_space<vmem>>, %arg4: memref<1x8x64xf32, #tpu.memory_space<vmem>>, %arg5: memref<1x2x64xf32, #tpu.memory_space<vmem>>) attributes {dimension_semantics = [#tpu.dimension_semantics<parallel>, #tpu.dimension_semantics<arbitrary>], iteration_bounds = array<i64: 2, 2>, scalar_prefetch = 0 : i64, scratch_operands = 0 : i64, tpu.core_type = #tpu.core_type<tc>, window_params = [{transform_indices = @transform_0, window_bounds = array<i64: 1, 18, 64>}, {pipeline_mode = #tpu.pipeline_mode<synchronous>, transform_indices = @transform_1, window_bounds = array<i64: 3, 64, 64>}, {transform_indices = @transform_2, window_bounds = array<i64: 1, 8, 64>}, {transform_indices = @transform_3, window_bounds = array<i64: 1, 2, 64>}]} {
    %c0_i32 = arith.constant 0 : i32
    %0 = arith.cmpi eq, %arg1, %c0_i32 : i32
    %1 = arith.extui %0 : i1 to i32
    %c0_i32_0 = arith.constant 0 : i32
    %2 = arith.cmpi ne, %1, %c0_i32_0 : i32
    scf.if %2 {
      %cst_29 = arith.constant 0.000000e+00 : f32
      %49 = vector.broadcast %cst_29 : f32 to vector<2x64xf32>
      %c0_30 = arith.constant 0 : index
      %c0_31 = arith.constant 0 : index
      %c0_32 = arith.constant 0 : index
      %50 = vector.load %arg5[%c0_30, %c0_31, %c0_32] : memref<1x2x64xf32, #tpu.memory_space<vmem>>, vector<1x2x64xf32>
      %51 = vector.shape_cast %50 : vector<1x2x64xf32> to vector<2x64xf32>
      %52 = vector.shape_cast %49 : vector<2x64xf32> to vector<1x2x64xf32>
      tpu.vector_store %arg5[%c0_30, %c0_31, %c0_32], %52 {strides = array<i32>} : memref<1x2x64xf32, #tpu.memory_space<vmem>>, vector<1x2x64xf32>,
    } else {
    }
    %cst = arith.constant 0.000000e+00 : f32
    %3 = vector.broadcast %cst : f32 to vector<8x64xf32>
    %c8_i32 = arith.constant 8 : i32
    %4 = arith.muli %arg1, %c8_i32 : i32
    %c1_i32 = arith.constant 1 : i32
    %5 = arith.muli %4, %c1_i32 : i32
    %6 = tpu.assume_multiple %5, 8 : i32
    %c0_i32_1 = arith.constant 0 : i32
    %7 = arith.addi %6, %c0_i32_1 : i32
    %c0 = arith.constant 0 : index
    %8 = arith.index_cast %7 : i32 to index
    %c0_2 = arith.constant 0 : index
    %9 = vector.load %arg2[%c0, %8, %c0_2] : memref<1x18x64xf32, #tpu.memory_space<vmem>>, vector<1x8x64xf32>
    %10 = vector.shape_cast %9 : vector<1x8x64xf32> to vector<8x64xf32>
    %11 = arith.truncf %10 : vector<8x64xf32> to vector<8x64xbf16>
    %c0_3 = arith.constant 0 : index
    %c0_4 = arith.constant 0 : index
    %c0_5 = arith.constant 0 : index
    %12 = vector.load %arg3[%c0_3, %c0_4, %c0_5] : memref<3x64x64xbf16, #tpu.memory_space<vmem>>, vector<1x64x64xbf16>
    %13 = vector.shape_cast %12 : vector<1x64x64xbf16> to vector<64x64xbf16>
    %cst_6 = arith.constant dense<0.000000e+00> : vector<8x64xf32>
    %14 = tpu.matmul %11, %13, %cst_6 {dimension_numbers = #tpu.dot_dimension_numbers<[1], [0], [0], [1], [0, 0, 1, 1], [], []>} : vector<8x64xbf16>, vector<64x64xbf16>, vector<8x64xf32> -> vector<8x64xf32>
    %15 = arith.addf %3, %14 : vector<8x64xf32>
    %c1_i32_7 = arith.constant 1 : i32
    %16 = arith.addi %6, %c1_i32_7 : i32
    %c0_8 = arith.constant 0 : index
    %17 = arith.index_cast %16 : i32 to index
    %c0_9 = arith.constant 0 : index
    %18 = vector.load %arg2[%c0_8, %17, %c0_9] : memref<1x18x64xf32, #tpu.memory_space<vmem>>, vector<1x8x64xf32>
    %19 = vector.shape_cast %18 : vector<1x8x64xf32> to vector<8x64xf32>
    %20 = arith.truncf %19 : vector<8x64xf32> to vector<8x64xbf16>
    %c1 = arith.constant 1 : index
    %c0_10 = arith.constant 0 : index
    %c0_11 = arith.constant 0 : index
    %21 = vector.load %arg3[%c1, %c0_10, %c0_11] : memref<3x64x64xbf16, #tpu.memory_space<vmem>>, vector<1x64x64xbf16>
    %22 = vector.shape_cast %21 : vector<1x64x64xbf16> to vector<64x64xbf16>
    %cst_12 = arith.constant dense<0.000000e+00> : vector<8x64xf32>
    %23 = tpu.matmul %20, %22, %cst_12 {dimension_numbers = #tpu.dot_dimension_numbers<[1], [0], [0], [1], [0, 0, 1, 1], [], []>} : vector<8x64xbf16>, vector<64x64xbf16>, vector<8x64xf32> -> vector<8x64xf32>
    %24 = arith.addf %15, %23 : vector<8x64xf32>
    %c2_i32 = arith.constant 2 : i32
    %25 = arith.addi %6, %c2_i32 : i32
    %c0_13 = arith.constant 0 : index
    %26 = arith.index_cast %25 : i32 to index
    %c0_14 = arith.constant 0 : index
    %27 = vector.load %arg2[%c0_13, %26, %c0_14] : memref<1x18x64xf32, #tpu.memory_space<vmem>>, vector<1x8x64xf32>
    %28 = vector.shape_cast %27 : vector<1x8x64xf32> to vector<8x64xf32>
    %29 = arith.truncf %28 : vector<8x64xf32> to vector<8x64xbf16>
    %c2 = arith.constant 2 : index
    %c0_15 = arith.constant 0 : index
    %c0_16 = arith.constant 0 : index
    %30 = vector.load %arg3[%c2, %c0_15, %c0_16] : memref<3x64x64xbf16, #tpu.memory_space<vmem>>, vector<1x64x64xbf16>
    %31 = vector.shape_cast %30 : vector<1x64x64xbf16> to vector<64x64xbf16>
    %cst_17 = arith.constant dense<0.000000e+00> : vector<8x64xf32>
    %32 = tpu.matmul %29, %31, %cst_17 {dimension_numbers = #tpu.dot_dimension_numbers<[1], [0], [0], [1], [0, 0, 1, 1], [], []>} : vector<8x64xbf16>, vector<64x64xbf16>, vector<8x64xf32> -> vector<8x64xf32>
    %33 = arith.addf %24, %32 : vector<8x64xf32>
    %c0_18 = arith.constant 0 : index
    %c0_19 = arith.constant 0 : index
    %c0_20 = arith.constant 0 : index
    %34 = vector.load %arg4[%c0_18, %c0_19, %c0_20] : memref<1x8x64xf32, #tpu.memory_space<vmem>>, vector<1x8x64xf32>
    %35 = vector.shape_cast %34 : vector<1x8x64xf32> to vector<8x64xf32>
    %36 = vector.shape_cast %33 : vector<8x64xf32> to vector<1x8x64xf32>
    tpu.vector_store %arg4[%c0_18, %c0_19, %c0_20], %36 {strides = array<i32>} : memref<1x8x64xf32, #tpu.memory_space<vmem>>, vector<1x8x64xf32>,
    %cst_21 = arith.constant dense<0.000000e+00> : vector<64xf32>
    %37 = vector.multi_reduction <add>, %33, %cst_21 [0] : vector<8x64xf32> to vector<64xf32>
    %38 = vector.shape_cast %37 : vector<64xf32> to vector<1x64xf32>
    %39 = arith.mulf %33, %33 : vector<8x64xf32>
    %cst_22 = arith.constant dense<0.000000e+00> : vector<64xf32>
    %40 = vector.multi_reduction <add>, %39, %cst_22 [0] : vector<8x64xf32> to vector<64xf32>
    %41 = vector.shape_cast %40 : vector<64xf32> to vector<1x64xf32>
    %c0_23 = arith.constant 0 : index
    %c0_24 = arith.constant 0 : index
    %c0_25 = arith.constant 0 : index
    %42 = vector.load %arg5[%c0_23, %c0_24, %c0_25] : memref<1x2x64xf32, #tpu.memory_space<vmem>>, vector<1x2x64xf32>
    %43 = vector.shape_cast %42 : vector<1x2x64xf32> to vector<2x64xf32>
    %44 = tpu.concatenate %38, %41 in 0 : vector<1x64xf32>, vector<1x64xf32> -> vector<2x64xf32>
    %45 = arith.addf %43, %44 : vector<2x64xf32>
    %c0_26 = arith.constant 0 : index
    %c0_27 = arith.constant 0 : index
    %c0_28 = arith.constant 0 : index
    %46 = vector.load %arg5[%c0_26, %c0_27, %c0_28] : memref<1x2x64xf32, #tpu.memory_space<vmem>>, vector<1x2x64xf32>
    %47 = vector.shape_cast %46 : vector<1x2x64xf32> to vector<2x64xf32>
    %48 = vector.shape_cast %45 : vector<2x64xf32> to vector<1x2x64xf32>
    tpu.vector_store %arg5[%c0_26, %c0_27, %c0_28], %48 {strides = array<i32>} : memref<1x2x64xf32, #tpu.memory_space<vmem>>, vector<1x2x64xf32>,
    return
  }
  func.func @transform_0(%arg0: i32, %arg1: i32) -> (i32, i32, i32) {
    %c0_i32 = arith.constant 0 : i32
    %c0_i32_0 = arith.constant 0 : i32
    %c0_i32_1 = arith.constant 0 : i32
    return %arg0, %c0_i32, %c0_i32_0 : i32, i32, i32
  }
  func.func @transform_1(%arg0: i32, %arg1: i32) -> (i32, i32, i32) {
    %c0_i32 = arith.constant 0 : i32
    %c0_i32_0 = arith.constant 0 : i32
    %c0_i32_1 = arith.constant 0 : i32
    %c0_i32_2 = arith.constant 0 : i32
    return %c0_i32, %c0_i32_0, %c0_i32_1 : i32, i32, i32
  }
  func.func @transform_2(%arg0: i32, %arg1: i32) -> (i32, i32, i32) {
    %c0_i32 = arith.constant 0 : i32
    %c0_i32_0 = arith.constant 0 : i32
    return %arg0, %arg1, %c0_i32 : i32, i32, i32
  }
  func.func @transform_3(%arg0: i32, %arg1: i32) -> (i32, i32, i32) {
    %c0_i32 = arith.constant 0 : i32
    %c0_i32_0 = arith.constant 0 : i32
    %c0_i32_1 = arith.constant 0 : i32
    return %arg0, %c0_i32, %c0_i32_0 : i32, i32, i32
  }
}

module attributes {stable_mosaic.version = 11 : i64} {
  func.func @_bn1_conv2_stats_kernel(%arg0: i32, %arg1: i32, %arg2: memref<1x16x64xf32, #tpu.memory_space<vmem>>, %arg3: memref<1x64xf32, #tpu.memory_space<vmem>>, %arg4: memref<1x64xf32, #tpu.memory_space<vmem>>, %arg5: memref<3x64x64xbf16, #tpu.memory_space<vmem>>, %arg6: memref<1x8x64xf32, #tpu.memory_space<vmem>>, %arg7: memref<1x2x64xf32, #tpu.memory_space<vmem>>, %arg8: memref<18x64xf32, #tpu.memory_space<vmem>>) attributes {dimension_semantics = [#tpu.dimension_semantics<parallel>, #tpu.dimension_semantics<arbitrary>], iteration_bounds = array<i64: 2, 2>, scalar_prefetch = 0 : i64, scratch_operands = 1 : i64, tpu.core_type = #tpu.core_type<tc>, window_params = [{transform_indices = @transform_0, window_bounds = array<i64: 1, 16, 64>}, {pipeline_mode = #tpu.pipeline_mode<synchronous>, transform_indices = @transform_1, window_bounds = array<i64: 1, 64>}, {pipeline_mode = #tpu.pipeline_mode<synchronous>, transform_indices = @transform_2, window_bounds = array<i64: 1, 64>}, {pipeline_mode = #tpu.pipeline_mode<synchronous>, transform_indices = @transform_3, window_bounds = array<i64: 3, 64, 64>}, {transform_indices = @transform_4, window_bounds = array<i64: 1, 8, 64>}, {transform_indices = @transform_5, window_bounds = array<i64: 1, 2, 64>}]} {
    %c0_i32 = arith.constant 0 : i32
    %0 = arith.cmpi eq, %arg1, %c0_i32 : i32
    %1 = arith.extui %0 : i1 to i32
    %c0_i32_0 = arith.constant 0 : i32
    %2 = arith.cmpi ne, %1, %c0_i32_0 : i32
    scf.if %2 {
      %cst_25 = arith.constant 0.000000e+00 : f32
      %45 = vector.broadcast %cst_25 : f32 to vector<2x64xf32>
      %c0_26 = arith.constant 0 : index
      %c0_27 = arith.constant 0 : index
      %c0_28 = arith.constant 0 : index
      %46 = vector.load %arg7[%c0_26, %c0_27, %c0_28] : memref<1x2x64xf32, #tpu.memory_space<vmem>>, vector<1x2x64xf32>
      %47 = vector.shape_cast %46 : vector<1x2x64xf32> to vector<2x64xf32>
      %48 = vector.shape_cast %45 : vector<2x64xf32> to vector<1x2x64xf32>
      tpu.vector_store %arg7[%c0_26, %c0_27, %c0_28], %48 {strides = array<i32>} : memref<1x2x64xf32, #tpu.memory_space<vmem>>, vector<1x2x64xf32>,
      %cst_29 = arith.constant 0.000000e+00 : f32
      %49 = vector.broadcast %cst_29 : f32 to vector<18x64xf32>
      %c0_30 = arith.constant 0 : index
      %c0_31 = arith.constant 0 : index
      %50 = vector.load %arg8[%c0_30, %c0_31] : memref<18x64xf32, #tpu.memory_space<vmem>>, vector<18x64xf32>
      tpu.vector_store %arg8[%c0_30, %c0_31], %49 {strides = array<i32>} : memref<18x64xf32, #tpu.memory_space<vmem>>, vector<18x64xf32>,
      %c0_32 = arith.constant 0 : index
      %c0_33 = arith.constant 0 : index
      %c0_34 = arith.constant 0 : index
      %51 = vector.load %arg2[%c0_32, %c0_33, %c0_34] : memref<1x16x64xf32, #tpu.memory_space<vmem>>, vector<1x16x64xf32>
      %52 = vector.shape_cast %51 : vector<1x16x64xf32> to vector<16x64xf32>
      %c0_35 = arith.constant 0 : index
      %c0_36 = arith.constant 0 : index
      %53 = vector.load %arg3[%c0_35, %c0_36] : memref<1x64xf32, #tpu.memory_space<vmem>>, vector<1x64xf32>
      %54 = vector.broadcast %53 : vector<1x64xf32> to vector<16x64xf32>
      %55 = arith.mulf %52, %54 : vector<16x64xf32>
      %c0_37 = arith.constant 0 : index
      %c0_38 = arith.constant 0 : index
      %56 = vector.load %arg4[%c0_37, %c0_38] : memref<1x64xf32, #tpu.memory_space<vmem>>, vector<1x64xf32>
      %57 = vector.broadcast %56 : vector<1x64xf32> to vector<16x64xf32>
      %58 = arith.addf %55, %57 : vector<16x64xf32>
      %cst_39 = arith.constant 0.000000e+00 : f32
      %59 = vector.broadcast %cst_39 : f32 to vector<16x64xf32>
      %60 = arith.maximumf %58, %59 : vector<16x64xf32>
      %c1_40 = arith.constant 1 : index
      %c0_41 = arith.constant 0 : index
      %61 = vector.load %arg8[%c1_40, %c0_41] : memref<18x64xf32, #tpu.memory_space<vmem>>, vector<16x64xf32>
      tpu.vector_store %arg8[%c1_40, %c0_41], %60 {strides = array<i32>} : memref<18x64xf32, #tpu.memory_space<vmem>>, vector<16x64xf32>,
    } else {
    }
    %cst = arith.constant 0.000000e+00 : f32
    %3 = vector.broadcast %cst : f32 to vector<8x64xf32>
    %c8_i32 = arith.constant 8 : i32
    %4 = arith.muli %arg1, %c8_i32 : i32
    %5 = tpu.assume_multiple %4, 8 : i32
    %c0_i32_1 = arith.constant 0 : i32
    %6 = arith.addi %5, %c0_i32_1 : i32
    %7 = arith.index_cast %6 : i32 to index
    %c0 = arith.constant 0 : index
    %8 = vector.load %arg8[%7, %c0] : memref<18x64xf32, #tpu.memory_space<vmem>>, vector<8x64xf32>
    %9 = arith.truncf %8 : vector<8x64xf32> to vector<8x64xbf16>
    %c0_2 = arith.constant 0 : index
    %c0_3 = arith.constant 0 : index
    %c0_4 = arith.constant 0 : index
    %10 = vector.load %arg5[%c0_2, %c0_3, %c0_4] : memref<3x64x64xbf16, #tpu.memory_space<vmem>>, vector<1x64x64xbf16>
    %11 = vector.shape_cast %10 : vector<1x64x64xbf16> to vector<64x64xbf16>
    %cst_5 = arith.constant dense<0.000000e+00> : vector<8x64xf32>
    %12 = tpu.matmul %9, %11, %cst_5 {dimension_numbers = #tpu.dot_dimension_numbers<[1], [0], [0], [1], [0, 0, 1, 1], [], []>} : vector<8x64xbf16>, vector<64x64xbf16>, vector<8x64xf32> -> vector<8x64xf32>
    %13 = arith.addf %3, %12 : vector<8x64xf32>
    %c1_i32 = arith.constant 1 : i32
    %14 = arith.addi %5, %c1_i32 : i32
    %15 = arith.index_cast %14 : i32 to index
    %c0_6 = arith.constant 0 : index
    %16 = vector.load %arg8[%15, %c0_6] : memref<18x64xf32, #tpu.memory_space<vmem>>, vector<8x64xf32>
    %17 = arith.truncf %16 : vector<8x64xf32> to vector<8x64xbf16>
    %c1 = arith.constant 1 : index
    %c0_7 = arith.constant 0 : index
    %c0_8 = arith.constant 0 : index
    %18 = vector.load %arg5[%c1, %c0_7, %c0_8] : memref<3x64x64xbf16, #tpu.memory_space<vmem>>, vector<1x64x64xbf16>
    %19 = vector.shape_cast %18 : vector<1x64x64xbf16> to vector<64x64xbf16>
    %cst_9 = arith.constant dense<0.000000e+00> : vector<8x64xf32>
    %20 = tpu.matmul %17, %19, %cst_9 {dimension_numbers = #tpu.dot_dimension_numbers<[1], [0], [0], [1], [0, 0, 1, 1], [], []>} : vector<8x64xbf16>, vector<64x64xbf16>, vector<8x64xf32> -> vector<8x64xf32>
    %21 = arith.addf %13, %20 : vector<8x64xf32>
    %c2_i32 = arith.constant 2 : i32
    %22 = arith.addi %5, %c2_i32 : i32
    %23 = arith.index_cast %22 : i32 to index
    %c0_10 = arith.constant 0 : index
    %24 = vector.load %arg8[%23, %c0_10] : memref<18x64xf32, #tpu.memory_space<vmem>>, vector<8x64xf32>
    %25 = arith.truncf %24 : vector<8x64xf32> to vector<8x64xbf16>
    %c2 = arith.constant 2 : index
    %c0_11 = arith.constant 0 : index
    %c0_12 = arith.constant 0 : index
    %26 = vector.load %arg5[%c2, %c0_11, %c0_12] : memref<3x64x64xbf16, #tpu.memory_space<vmem>>, vector<1x64x64xbf16>
    %27 = vector.shape_cast %26 : vector<1x64x64xbf16> to vector<64x64xbf16>
    %cst_13 = arith.constant dense<0.000000e+00> : vector<8x64xf32>
    %28 = tpu.matmul %25, %27, %cst_13 {dimension_numbers = #tpu.dot_dimension_numbers<[1], [0], [0], [1], [0, 0, 1, 1], [], []>} : vector<8x64xbf16>, vector<64x64xbf16>, vector<8x64xf32> -> vector<8x64xf32>
    %29 = arith.addf %21, %28 : vector<8x64xf32>
    %c0_14 = arith.constant 0 : index
    %c0_15 = arith.constant 0 : index
    %c0_16 = arith.constant 0 : index
    %30 = vector.load %arg6[%c0_14, %c0_15, %c0_16] : memref<1x8x64xf32, #tpu.memory_space<vmem>>, vector<1x8x64xf32>
    %31 = vector.shape_cast %30 : vector<1x8x64xf32> to vector<8x64xf32>
    %32 = vector.shape_cast %29 : vector<8x64xf32> to vector<1x8x64xf32>
    tpu.vector_store %arg6[%c0_14, %c0_15, %c0_16], %32 {strides = array<i32>} : memref<1x8x64xf32, #tpu.memory_space<vmem>>, vector<1x8x64xf32>,
    %cst_17 = arith.constant dense<0.000000e+00> : vector<64xf32>
    %33 = vector.multi_reduction <add>, %29, %cst_17 [0] : vector<8x64xf32> to vector<64xf32>
    %34 = vector.shape_cast %33 : vector<64xf32> to vector<1x64xf32>
    %35 = arith.mulf %29, %29 : vector<8x64xf32>
    %cst_18 = arith.constant dense<0.000000e+00> : vector<64xf32>
    %36 = vector.multi_reduction <add>, %35, %cst_18 [0] : vector<8x64xf32> to vector<64xf32>
    %37 = vector.shape_cast %36 : vector<64xf32> to vector<1x64xf32>
    %c0_19 = arith.constant 0 : index
    %c0_20 = arith.constant 0 : index
    %c0_21 = arith.constant 0 : index
    %38 = vector.load %arg7[%c0_19, %c0_20, %c0_21] : memref<1x2x64xf32, #tpu.memory_space<vmem>>, vector<1x2x64xf32>
    %39 = vector.shape_cast %38 : vector<1x2x64xf32> to vector<2x64xf32>
    %40 = tpu.concatenate %34, %37 in 0 : vector<1x64xf32>, vector<1x64xf32> -> vector<2x64xf32>
    %41 = arith.addf %39, %40 : vector<2x64xf32>
    %c0_22 = arith.constant 0 : index
    %c0_23 = arith.constant 0 : index
    %c0_24 = arith.constant 0 : index
    %42 = vector.load %arg7[%c0_22, %c0_23, %c0_24] : memref<1x2x64xf32, #tpu.memory_space<vmem>>, vector<1x2x64xf32>
    %43 = vector.shape_cast %42 : vector<1x2x64xf32> to vector<2x64xf32>
    %44 = vector.shape_cast %41 : vector<2x64xf32> to vector<1x2x64xf32>
    tpu.vector_store %arg7[%c0_22, %c0_23, %c0_24], %44 {strides = array<i32>} : memref<1x2x64xf32, #tpu.memory_space<vmem>>, vector<1x2x64xf32>,
    return
  }
  func.func @transform_0(%arg0: i32, %arg1: i32) -> (i32, i32, i32) {
    %c0_i32 = arith.constant 0 : i32
    %c0_i32_0 = arith.constant 0 : i32
    %c0_i32_1 = arith.constant 0 : i32
    return %arg0, %c0_i32, %c0_i32_0 : i32, i32, i32
  }
  func.func @transform_1(%arg0: i32, %arg1: i32) -> (i32, i32) {
    %c0_i32 = arith.constant 0 : i32
    %c0_i32_0 = arith.constant 0 : i32
    %c0_i32_1 = arith.constant 0 : i32
    return %c0_i32, %c0_i32_0 : i32, i32
  }
  func.func @transform_2(%arg0: i32, %arg1: i32) -> (i32, i32) {
    %c0_i32 = arith.constant 0 : i32
    %c0_i32_0 = arith.constant 0 : i32
    %c0_i32_1 = arith.constant 0 : i32
    return %c0_i32, %c0_i32_0 : i32, i32
  }
  func.func @transform_3(%arg0: i32, %arg1: i32) -> (i32, i32, i32) {
    %c0_i32 = arith.constant 0 : i32
    %c0_i32_0 = arith.constant 0 : i32
    %c0_i32_1 = arith.constant 0 : i32
    %c0_i32_2 = arith.constant 0 : i32
    return %c0_i32, %c0_i32_0, %c0_i32_1 : i32, i32, i32
  }
  func.func @transform_4(%arg0: i32, %arg1: i32) -> (i32, i32, i32) {
    %c0_i32 = arith.constant 0 : i32
    %c0_i32_0 = arith.constant 0 : i32
    return %arg0, %arg1, %c0_i32 : i32, i32, i32
  }
  func.func @transform_5(%arg0: i32, %arg1: i32) -> (i32, i32, i32) {
    %c0_i32 = arith.constant 0 : i32
    %c0_i32_0 = arith.constant 0 : i32
    %c0_i32_1 = arith.constant 0 : i32
    return %arg0, %c0_i32, %c0_i32_0 : i32, i32, i32
  }
}

module attributes {stable_mosaic.version = 11 : i64} {
  func.func @_bn2_add_relu_kernel(%arg0: i32, %arg1: i32, %arg2: memref<1x8x64xf32, #tpu.memory_space<vmem>>, %arg3: memref<1x64xf32, #tpu.memory_space<vmem>>, %arg4: memref<1x64xf32, #tpu.memory_space<vmem>>, %arg5: memref<1x18x64xf32, #tpu.memory_space<vmem>>, %arg6: memref<1x8x64xf32, #tpu.memory_space<vmem>>) attributes {dimension_semantics = [#tpu.dimension_semantics<parallel>, #tpu.dimension_semantics<parallel>], iteration_bounds = array<i64: 2, 2>, scalar_prefetch = 0 : i64, scratch_operands = 0 : i64, tpu.core_type = #tpu.core_type<tc>, window_params = [{transform_indices = @transform_0, window_bounds = array<i64: 1, 8, 64>}, {pipeline_mode = #tpu.pipeline_mode<synchronous>, transform_indices = @transform_1, window_bounds = array<i64: 1, 64>}, {pipeline_mode = #tpu.pipeline_mode<synchronous>, transform_indices = @transform_2, window_bounds = array<i64: 1, 64>}, {transform_indices = @transform_3, window_bounds = array<i64: 1, 18, 64>}, {transform_indices = @transform_4, window_bounds = array<i64: 1, 8, 64>}]} {
    %c0 = arith.constant 0 : index
    %c0_0 = arith.constant 0 : index
    %c0_1 = arith.constant 0 : index
    %0 = vector.load %arg2[%c0, %c0_0, %c0_1] : memref<1x8x64xf32, #tpu.memory_space<vmem>>, vector<1x8x64xf32>
    %1 = vector.shape_cast %0 : vector<1x8x64xf32> to vector<8x64xf32>
    %c0_2 = arith.constant 0 : index
    %c0_3 = arith.constant 0 : index
    %2 = vector.load %arg3[%c0_2, %c0_3] : memref<1x64xf32, #tpu.memory_space<vmem>>, vector<1x64xf32>
    %3 = vector.broadcast %2 : vector<1x64xf32> to vector<8x64xf32>
    %4 = arith.mulf %1, %3 : vector<8x64xf32>
    %c0_4 = arith.constant 0 : index
    %c0_5 = arith.constant 0 : index
    %5 = vector.load %arg4[%c0_4, %c0_5] : memref<1x64xf32, #tpu.memory_space<vmem>>, vector<1x64xf32>
    %6 = vector.broadcast %5 : vector<1x64xf32> to vector<8x64xf32>
    %7 = arith.addf %4, %6 : vector<8x64xf32>
    %c8_i32 = arith.constant 8 : i32
    %8 = arith.muli %arg1, %c8_i32 : i32
    %9 = tpu.assume_multiple %8, 8 : i32
    %c1_i32 = arith.constant 1 : i32
    %10 = arith.addi %9, %c1_i32 : i32
    %c0_6 = arith.constant 0 : index
    %11 = arith.index_cast %10 : i32 to index
    %c0_7 = arith.constant 0 : index
    %12 = vector.load %arg5[%c0_6, %11, %c0_7] : memref<1x18x64xf32, #tpu.memory_space<vmem>>, vector<1x8x64xf32>
    %13 = vector.shape_cast %12 : vector<1x8x64xf32> to vector<8x64xf32>
    %14 = arith.addf %7, %13 : vector<8x64xf32>
    %cst = arith.constant 0.000000e+00 : f32
    %15 = vector.broadcast %cst : f32 to vector<8x64xf32>
    %16 = arith.maximumf %14, %15 : vector<8x64xf32>
    %c0_8 = arith.constant 0 : index
    %c0_9 = arith.constant 0 : index
    %c0_10 = arith.constant 0 : index
    %17 = vector.load %arg6[%c0_8, %c0_9, %c0_10] : memref<1x8x64xf32, #tpu.memory_space<vmem>>, vector<1x8x64xf32>
    %18 = vector.shape_cast %17 : vector<1x8x64xf32> to vector<8x64xf32>
    %19 = vector.shape_cast %16 : vector<8x64xf32> to vector<1x8x64xf32>
    tpu.vector_store %arg6[%c0_8, %c0_9, %c0_10], %19 {strides = array<i32>} : memref<1x8x64xf32, #tpu.memory_space<vmem>>, vector<1x8x64xf32>,
    return
  }
  func.func @transform_0(%arg0: i32, %arg1: i32) -> (i32, i32, i32) {
    %c0_i32 = arith.constant 0 : i32
    %c0_i32_0 = arith.constant 0 : i32
    return %arg0, %arg1, %c0_i32 : i32, i32, i32
  }
  func.func @transform_1(%arg0: i32, %arg1: i32) -> (i32, i32) {
    %c0_i32 = arith.constant 0 : i32
    %c0_i32_0 = arith.constant 0 : i32
    %c0_i32_1 = arith.constant 0 : i32
    return %c0_i32, %c0_i32_0 : i32, i32
  }
  func.func @transform_2(%arg0: i32, %arg1: i32) -> (i32, i32) {
    %c0_i32 = arith.constant 0 : i32
    %c0_i32_0 = arith.constant 0 : i32
    %c0_i32_1 = arith.constant 0 : i32
    return %c0_i32, %c0_i32_0 : i32, i32
  }
  func.func @transform_3(%arg0: i32, %arg1: i32) -> (i32, i32, i32) {
    %c0_i32 = arith.constant 0 : i32
    %c0_i32_0 = arith.constant 0 : i32
    %c0_i32_1 = arith.constant 0 : i32
    return %arg0, %c0_i32, %c0_i32_0 : i32, i32, i32
  }
  func.func @transform_4(%arg0: i32, %arg1: i32) -> (i32, i32, i32) {
    %c0_i32 = arith.constant 0 : i32
    %c0_i32_0 = arith.constant 0 : i32
    return %arg0, %arg1, %c0_i32 : i32, i32, i32
  }
}

</mosaic_0001>

<bundles_post_ra>
// kernel: residual_forward.3
= control target key start
LH: loop header
LB: loop body
LE: loop exit
PB: predicated region body
PF: predicated region fallthrough
CT: control target
= control target key end

     0   :  { %s809_s12 = smov 0   ;;  %s811_s13 = smov 0   ;;  %s925_s0 = inlined_call_operand.vmem [shape: f32[2,18,64], index: 0, kind: input, shape index: {}]   ;;  %s926_s1 = inlined_call_operand.vmem [shape: bf16[3,64,64], index: 1, kind: input, shape index: {}]   ;;  %s927_s2 = inlined_call_operand.vmem [shape: f32[2,16,64], index: 2, kind: output, shape index: {0}]   ;;  %s928_s3 = inlined_call_operand.vmem [shape: f32[2,2,64], index: 3, kind: output, shape index: {1}]  }
   0x1   :  { %s813_s14 = smov 0   ;;  %s815_s15 = smov 0  }
   0x2   :  { %s817_s16 = smov 0  }
   0x3 LB: > { %s23_s17 = sadd.s32 1, %s776_s14  ;;  %s26_s18 = sadd.s32 1, %s780_s15  ;;  %s784_s16 = sphi %s817_s16, %s14_s16   ;;  %s780_s15 = sphi %s815_s15, %s932_s15   ;;  %s776_s14 = sphi %s813_s14, %s931_s14   ;;  %s772_s13 = sphi %s811_s13, %s930_s13   ;;  %s768_s12 = sphi %s809_s12, %s929_s12  }
   0x4   : > { %p24_p0 = scmp.ge.s32.totalorder %s23_s17, 2  ;;  %p595_p1 = scmp.ge.s32.totalorder %s784_s16, 1 }
   0x5   : > { %p154_p2 = scmp.lt.s32.totalorder %s784_s16, 5 }
   0x6   : > { %s934_s17 = smov (%p24_p0, %s23_s17), 0  ;;  %s936_s18 = smov (!%p24_p0, %s26_s18), %s780_s15 }
   0x7   : > { %p155_p3 = pnand %p595_p1, %p154_p2  ;;  %p28_p4 = scmp.ge.s32.totalorder %s936_s18, 2 }
   0x8   : > { %p185_p5 = scmp.lt.s32.totalorder (!%p155_p3), %s772_s13, 1  ;;  %p192_p6 = scmp.lt.s32.totalorder (!%p155_p3), %s768_s12, 1 }
   0x9   : > { %s938_s18 = smov (%p28_p4, %s936_s18), 0  ;;  %158 = sbr.rel (%p155_p3) target bundleno = 273 (0x111), region = 28 }
   0xa   : > { %p600_p7 = scmp.ne.s32.totalorder (!%p155_p3), %s768_s12, 0 }
   0xe   : > { %s940_s13 = smov (!%p185_p5, %s772_s13), 1 }
   0xf   : > { %s193_s19 = scalar_select %p192_p6, %s768_s12, 1 }
  0x10   : > { %s690_s20 = smul.u32 24, %s940_s13  ;;  %s597_s21 = sshll.u32 %s940_s13, 1 }
  0x11   : > { %s195_s22 = sadd.s32 %s597_s21, %s193_s19  ;;  %s846_s25 = scalar_lea.vmem %s928_s3, %s597_s21 }
  0x12   : > { %s851_s28 = scalar_lea.vmem %s925_s0, %s690_s20  ;;  %s598_s29 = sshll.u32 %s195_s22, 3 }
  0x13   : > { %s856_s5 = scalar_lea.vmem %s927_s2, %s598_s29  ;;  %206 = sbr.rel (%p600_p7) target bundleno = 26 (0x1a), region = 32 }
  0x18   : > { %vm207_vm0 = vcmask 517120   ;;  %v786_v0 = vmov 0.0  }
  0x19   : > { %208 = vst.msk [vmem:[%s846_s25] sm:$0x3] %vm207_vm0, %v786_v0 }
  0x1a PF: > { %v734_v1 = vld [vmem:[%s926_s1 + $0x38] sm:$0xff]   ;;  %v787_v2 = vmov 0.0   ;;  %v736_v4 = vld [vmem:[%s926_s1 + $0x30] sm:$0xff]   ;;  %vm788_vm1 = vmmov 0   ;;  %s601_s20 = sshll.u32 %s768_s12, 3  ;;  %v738_v6 = vld [vmem:[%s926_s1 + $0x28] sm:$0xff]  }
  0x1b   : > { %654 = vmatprep.subr.bf16.mxu0 %v787_v2  ;;  %666 = vmatprep.subr.bf16.mxu1 %v787_v2  ;;  %v735_v3 = vld [vmem:[%s926_s1 + $0x18] sm:$0xff]   ;;  %v737_v5 = vld [vmem:[%s926_s1 + $0x10] sm:$0xff]   ;;  %v739_v7 = vld [vmem:[%s926_s1 + $0x8] sm:$0xff]   ;;  %s210_s26 = scalar_lea.vmem %s851_s28, %s601_s20  ;;  %vm258_vm2 = vcmask 523264   ;;  %vm467_vm3 = vcmask 1040384   ;;  %vm470_vm4 = vcmask 517120  }
  0x1c   : > { %655 = vmatpush3.bf16.msra.mxu0 %v734_v1  ;;  %662 = vmatprep.mubr.msk.bf16.mxu0 %vm788_vm1, %v787_v2  ;;  %v740_v8 = vld [vmem:[%s926_s1 + $0x20] sm:$0xff]   ;;  %v742_v14 = vld [vmem:[%s926_s1 + $0x58] sm:$0xff]   ;;  %v743_v15 = vld [vmem:[%s926_s1 + $0x50] sm:$0xff]  }
  0x1d   : > { %667 = vmatpush3.bf16.msra.mxu1 %v735_v3  ;;  %656 = vmatprep.subr.bf16.mxu0 %v787_v2  ;;  %v741_v9 = vld [vmem:[%s926_s1] sm:$0xff]   ;;  %v744_v16 = vld [vmem:[%s926_s1 + $0x48] sm:$0xff]  }
  0x1e   : > { %668 = vmatprep.subr.bf16.mxu1 %v787_v2  ;;  %674 = vmatprep.mubr.msk.bf16.mxu1 %vm788_vm1, %v787_v2  ;;  %v603_v10 = vld [vmem:[%s210_s26 + $0x1] sm:$0xff] }
  0x1f   : > { %v211_v11 = vld [vmem:[%s210_s26] sm:$0xff]  ;;  %v224_v12 = vpack.c.bf16 %v603_v10, %v603_v10 }
  0x20   : > { %657 = vmatpush3.bf16.msra.mxu0 %v736_v4  ;;  %v212_v13 = vpack.c.bf16 %v211_v11, %v211_v11  ;;  %v745_v17 = vld [vmem:[%s926_s1 + $0x40] sm:$0xff]  }
  0x21   : > { %669 = vmatpush3.bf16.msra.mxu1 %v737_v5  ;;  %658 = vmatprep.subr.bf16.mxu0 %v787_v2  ;;  %v623_v18 = vld [vmem:[%s210_s26 + $0x2] sm:$0xff]  ;;  %v466_v49 = vld [vmem:[%s846_s25] sm:$0x3] }
  0x22   : > { %670 = vmatprep.subr.bf16.mxu1 %v787_v2  ;;  %v372_v19 = vpack.c.bf16 %v623_v18, %v623_v18 }
  0x24   : > { %659 = vmatpush3.bf16.msra.mxu0 %v738_v6 }
  0x25   : > { %671 = vmatpush3.bf16.msra.mxu1 %v739_v7  ;;  %660 = vmatprep.subr.bf16.mxu0 %v787_v2 }
  0x26   : > { %672 = vmatprep.subr.bf16.mxu1 %v787_v2 }
  0x28   : > { %661 = vmatpush3.bf16.msra.mxu0 %v740_v8 }
  0x29   : > { %673 = vmatpush3.bf16.msra.mxu1 %v741_v9  ;;  %678 = vmatprep.subr.bf16.mxu0 %v787_v2 }
  0x2b   : > { %663 = vmatmul.mubr.msk.bf16.vlgmr.msra.gmra.mxu0 %vm258_vm2, %v224_v12 }
  0x2c   : > { %675 = vmatmul.mubr.msk.bf16.vlgmr.msra.gmra.mxu1 %vm258_vm2, %v212_v13  ;;  %679 = vmatpush3.bf16.msra.mxu0 %v742_v14 }
  0x2d   : > { %680 = vmatprep.subr.bf16.mxu0 %v787_v2  ;;  %686 = vmatprep.mubr.msk.bf16.mxu0 %vm788_vm1, %v787_v2 }
  0x30   : > { %681 = vmatpush3.bf16.msra.mxu0 %v743_v15 }
  0x31   : > { %682 = vmatprep.subr.bf16.mxu0 %v787_v2 }
  0x34   : > { %683 = vmatpush3.bf16.msra.mxu0 %v744_v16 }
  0x35   : > { %684 = vmatprep.subr.bf16.mxu0 %v787_v2 }
  0x38   : > { %685 = vmatpush3.bf16.msra.mxu0 %v745_v17 }
  0x3b   : > { %687 = vmatmul.mubr.msk.bf16.vlgmr.msra.gmra.mxu0 %vm258_vm2, %v372_v19 }
  0xeb   : > { %v296_v20 = vpop.f32.mrf.mxu0 }
  0xec   : > { %v363_v21 = vpop.f32.mrf.mxu1 }
  0xed   : > { %v664_v22 = vpop.f32.mrf.mxu0  ;;  %v364_v28 = vadd.f32 %v363_v21, %v296_v20 }
  0xee   : > { %v676_v23 = vpop.f32.mrf.mxu1 }
  0xef   : > { %v299_v24 = vpop.f32.mrf.mxu0 }
  0xf0   : > { %v366_v25 = vpop.f32.mrf.mxu1 }
  0xf1   : > { %v665_v26 = vpop.f32.mrf.mxu0 }
  0xf2   : > { %v677_v27 = vpop.f32.mrf.mxu1 }
  0xfb   : > { %v443_v29 = vpop.f32.mrf.mxu0 }
  0xfc   : > { %v449_v30 = vadd.f32 %v443_v29, %v364_v28 }
  0xfd   : > { %v688_v31 = vpop.f32.mrf.mxu0 }
  0xfe   : > { %450 = vst.msk [vmem:[%s856_s5] sm:$0xff] %vm258_vm2, %v449_v30  ;;  %v451_v32 = vsel %vm258_vm2, %v449_v30, 0.0  ;;  %v458_v33 = vmul.f32 %v449_v30, %v449_v30 }
  0xff   : > { %v452_v34 = vrot.slane %v451_v32, 4  ;;  %v446_v35 = vpop.f32.mrf.mxu0 }
 0x100   : > { %v459_v36 = vsel %vm258_vm2, %v458_v33, 0.0 }
 0x101   : > { %v453_v37 = vadd.f32 %v452_v34, %v451_v32  ;;  %v460_v38 = vrot.slane %v459_v36, 4  ;;  %v689_v39 = vpop.f32.mrf.mxu0 }
 0x103   : > { %v454_v40 = vrot.slane %v453_v37, 2  ;;  %v461_v41 = vadd.f32 %v460_v38, %v459_v36 }
 0x105   : > { %v455_v42 = vadd.f32 %v454_v40, %v453_v37  ;;  %v462_v43 = vrot.slane %v461_v41, 2 }
 0x107   : > { %v456_v44 = vrot.slane %v455_v42, 1  ;;  %v463_v45 = vadd.f32 %v462_v43, %v461_v41 }
 0x109   : > { %v464_v46 = vrot.slane %v463_v45, 1  ;;  %v457_v47 = vadd.f32 %v456_v44, %v455_v42 }
 0x10b   : > { %v465_v48 = vadd.f32 %v464_v46, %v463_v45 }
 0x10d   : > { %v468_v50 = vsel %vm467_vm3, %v457_v47, %v465_v48 }
 0x10e   : > { %v469_v51 = vadd.f32 %v468_v50, %v466_v49 }
 0x110   : > { %471 = vst.msk [vmem:[%s846_s25] sm:$0x3] %vm470_vm4, %v469_v51 }
 0x111 PF: > { %s14_s16 = sadd.s32 1, %s784_s16   ;;  %s929_s12 = smov %s776_s14 }
 0x112   : > { %p11_p8 = scmp.ge.s32.totalorder %s14_s16, 6   ;;  %s930_s13 = smov %s780_s15 }
 0x113   : > { %s931_s14 = smov %s934_s17  ;;  %s932_s15 = smov %s938_s18 }
 0x114   :  { %13 = sbr.rel (!%p11_p8) target bundleno = 3 (0x3), region = 79 }

// kernel: squeeze.4
= control target key start
LH: loop header
LB: loop body
LE: loop exit
PB: predicated region body
PF: predicated region fallthrough
CT: control target
= control target key end

     0   :  { %s131_s8 = smov 116   ;;  %s132_s9 = smov 120   ;;  %vm8_vm0 = vcmask 31744   ;;  %s222_s0 = inlined_call_operand.vmem [shape: f32[64], index: 0, kind: input, shape index: {}]   ;;  %s223_s1 = inlined_call_operand.vmem [shape: f32[16,4], index: 1, kind: output, shape index: {}]  }
   0x1   :  { %v5_v0 = vld [vmem:[%s222_s0] sm:$0x1]  ;;  %s130_s0 = smov 124   ;;  %s133_s10 = smov 112  }
   0x2   :  { %6 = vst [vmem:[#allocation0] sm:$0x1] %v5_v0  ;;  %s134_s11 = smov 108   ;;  %s135_s12 = smov 104  }
   0x3   :  { %s136_s13 = smov 100   ;;  %s137_s14 = smov 96  }
   0x4   :  { %s138_s17 = smov 92   ;;  %s139_s18 = smov 88  }
   0x5   :  { %s140_s19 = smov 84   ;;  %s141_s20 = smov 80  }
   0x6   :  { %s142_s21 = smov 76   ;;  %s143_s22 = smov 72  }
   0x7   :  { %s144_s23 = smov 68  }
   0x9   :  { %v10_v1 = vld [vmem:[#allocation0] sm:$0x1]  }
   0xa   :  { %v22_v2 = vld [vmem:[#allocation0] sm:$0x1]   ;;  %11 = vrot.lane.b32.xlu0 %v10_v1, %s130_s0 }
   0xb   :  { %23 = vrot.lane.b32.xlu1 %v22_v2, %s131_s8  ;;  %v16_v3 = vld [vmem:[#allocation0] sm:$0x1]  }
   0xc   :  { %v28_v4 = vld [vmem:[#allocation0] sm:$0x1]  }
   0xd   :  { %v34_v5 = vld [vmem:[#allocation0] sm:$0x1]  }
   0xe   :  { %17 = vrot.lane.b32.xlu0 %v16_v3, %s132_s9  ;;  %v40_v6 = vld [vmem:[#allocation0] sm:$0x1]  }
   0xf   :  { %29 = vrot.lane.b32.xlu1 %v28_v4, %s133_s10  ;;  %v46_v7 = vld [vmem:[#allocation0] sm:$0x1]  }
  0x10   :  { %v52_v8 = vld [vmem:[#allocation0] sm:$0x1]  }
  0x11   :  { %v58_v9 = vld [vmem:[#allocation0] sm:$0x1]  }
  0x12   :  { %35 = vrot.lane.b32.xlu0 %v34_v5, %s134_s11  ;;  %v64_v10 = vld [vmem:[#allocation0] sm:$0x1]  }
  0x13   :  { %41 = vrot.lane.b32.xlu1 %v40_v6, %s135_s12  ;;  %v7_v11 = vld [vmem:[#allocation0] sm:$0x1]  }
  0x14   :  { %9 = vst.msk [vmem:[%s223_s1] sm:$0x1] %vm8_vm0, %v7_v11   ;;  %v70_v12 = vld [vmem:[#allocation0] sm:$0x1]  }
  0x15   :  { %v76_v13 = vld [vmem:[#allocation0] sm:$0x1]  }
  0x16   :  { %47 = vrot.lane.b32.xlu0 %v46_v7, %s136_s13  ;;  %v82_v14 = vld [vmem:[#allocation0] sm:$0x1]  }
  0x17   :  { %53 = vrot.lane.b32.xlu1 %v52_v8, %s137_s14  ;;  %v88_v15 = vld [vmem:[#allocation0] sm:$0x1]  }
  0x18   :  { %v94_v16 = vld [vmem:[#allocation0] sm:$0x1]  }
  0x1a   :  { %59 = vrot.lane.b32.xlu0 %v58_v9, %s138_s17 }
  0x1b   :  { %65 = vrot.lane.b32.xlu1 %v64_v10, %s139_s18 }
  0x1e   :  { %71 = vrot.lane.b32.xlu0 %v70_v12, %s140_s19 }
  0x1f   :  { %77 = vrot.lane.b32.xlu1 %v76_v13, %s141_s20 }
  0x22   :  { %83 = vrot.lane.b32.xlu0 %v82_v14, %s142_s21 }
  0x23   :  { %89 = vrot.lane.b32.xlu1 %v88_v15, %s143_s22 }
  0x26   :  { %95 = vrot.lane.b32.xlu0 %v94_v16, %s144_s23 }
  0x7c   :  { %v12_v17 = vpop.permute.xlu0 %11  }
  0x7d   :  { %v24_v18 = vpop.permute.xlu1 %23   ;;  %100 = vst.msk [vmem:[%s223_s1 + $0x1] sm:$0x1] %vm8_vm0, %v12_v17  }
  0x7e   :  { %102 = vst.msk [vmem:[%s223_s1 + $0x3] sm:$0x1] %vm8_vm0, %v24_v18  }
  0x80   :  { %v18_v19 = vpop.permute.xlu0 %17  }
  0x81   :  { %v30_v20 = vpop.permute.xlu1 %29   ;;  %101 = vst.msk [vmem:[%s223_s1 + $0x2] sm:$0x1] %vm8_vm0, %v18_v19  }
  0x82   :  { %103 = vst.msk [vmem:[%s223_s1 + $0x4] sm:$0x1] %vm8_vm0, %v30_v20  }
  0x84   :  { %v36_v21 = vpop.permute.xlu0 %35  }
  0x85   :  { %v42_v22 = vpop.permute.xlu1 %41   ;;  %104 = vst.msk [vmem:[%s223_s1 + $0x5] sm:$0x1] %vm8_vm0, %v36_v21  }
  0x86   :  { %105 = vst.msk [vmem:[%s223_s1 + $0x6] sm:$0x1] %vm8_vm0, %v42_v22  }
  0x88   :  { %v48_v23 = vpop.permute.xlu0 %47  }
  0x89   :  { %v54_v24 = vpop.permute.xlu1 %53   ;;  %106 = vst.msk [vmem:[%s223_s1 + $0x7] sm:$0x1] %vm8_vm0, %v48_v23  }
  0x8a   :  { %107 = vst.msk [vmem:[%s223_s1 + $0x8] sm:$0x1] %vm8_vm0, %v54_v24  }
  0x8c   :  { %v60_v25 = vpop.permute.xlu0 %59  }
  0x8d   :  { %v66_v26 = vpop.permute.xlu1 %65   ;;  %108 = vst.msk [vmem:[%s223_s1 + $0x9] sm:$0x1] %vm8_vm0, %v60_v25  }
  0x8e   :  { %109 = vst.msk [vmem:[%s223_s1 + $0xa] sm:$0x1] %vm8_vm0, %v66_v26  }
  0x90   :  { %v72_v27 = vpop.permute.xlu0 %71  }
  0x91   :  { %v78_v28 = vpop.permute.xlu1 %77   ;;  %110 = vst.msk [vmem:[%s223_s1 + $0xb] sm:$0x1] %vm8_vm0, %v72_v27  }
  0x92   :  { %111 = vst.msk [vmem:[%s223_s1 + $0xc] sm:$0x1] %vm8_vm0, %v78_v28  }
  0x94   :  { %v84_v29 = vpop.permute.xlu0 %83  }
  0x95   :  { %v90_v30 = vpop.permute.xlu1 %89   ;;  %112 = vst.msk [vmem:[%s223_s1 + $0xd] sm:$0x1] %vm8_vm0, %v84_v29  }
  0x96   :  { %113 = vst.msk [vmem:[%s223_s1 + $0xe] sm:$0x1] %vm8_vm0, %v90_v30  }
  0x98   :  { %v96_v31 = vpop.permute.xlu0 %95  }
  0x99   :  { %114 = vst.msk [vmem:[%s223_s1 + $0xf] sm:$0x1] %vm8_vm0, %v96_v31  }

// kernel: tile.23
= control target key start
LH: loop header
LB: loop body
LE: loop exit
PB: predicated region body
PF: predicated region fallthrough
CT: control target
= control target key end

     0   :  { %s28_s0 = inlined_call_operand.vmem [shape: f32[4], index: 0, kind: input, shape index: {}]   ;;  %s29_s1 = inlined_call_operand.vmem [shape: f32[16,4], index: 1, kind: output, shape index: {}]  }
   0x1   :  { %v4_v0 = vld [vmem:[%s28_s0] ss:$0 sm:$0xff] }
   0x2   :  { %5 = vst [vmem:[%s29_s1] sm:$0xff] %v4_v0  ;;  %8 = vst [vmem:[%s29_s1 + $0x8] sm:$0xff] %v4_v0 }

// kernel: tile.24
= control target key start
LH: loop header
LB: loop body
LE: loop exit
PB: predicated region body
PF: predicated region fallthrough
CT: control target
= control target key end

     0   :  { %s133_s10 = smov 60   ;;  %s134_s11 = smov 52   ;;  %vm3_vm0 = vcmask 31744   ;;  %vm9_vm1 = vcmask 523744   ;;  %vm15_vm2 = vcmask 490944   ;;  %vm21_vm3 = vcmask 458144   ;;  %s209_s0 = inlined_call_operand.vmem [shape: f32[16,4], index: 0, kind: input, shape index: {}]   ;;  %s210_s1 = inlined_call_operand.vmem [shape: f32[1,64], index: 1, kind: output, shape index: {}]  }
   0x1   :  { %v103_v0 = vld [vmem:[%s209_s0 + $0xf] sm:$0x1]   ;;  %v105_v1 = vld [vmem:[%s209_s0 + $0xd] sm:$0x1]   ;;  %v104_v2 = vld [vmem:[%s209_s0 + $0xe] sm:$0x1]  }
   0x2   :  { %7 = vrot.lane.b32.xlu0 %v103_v0, %s133_s10  ;;  %19 = vrot.lane.b32.xlu1 %v105_v1, %s134_s11  ;;  %v106_v3 = vld [vmem:[%s209_s0 + $0xc] sm:$0x1]   ;;  %s135_s16 = smov 56   ;;  %s136_s17 = smov 48   ;;  %v107_v4 = vld [vmem:[%s209_s0 + $0xb] sm:$0x1]  }
   0x3   :  { %v108_v5 = vld [vmem:[%s209_s0 + $0xa] sm:$0x1]   ;;  %v2_v6 = vld [vmem:[%s209_s0] sm:$0x1]   ;;  %s137_s24 = smov 44   ;;  %s138_s25 = smov 40  }
   0x4   :  { %4 = vst.msk [vmem:[#allocation0] sm:$0x1] %vm3_vm0, %v2_v6   ;;  %v109_v7 = vld [vmem:[%s209_s0 + $0x9] sm:$0x1]   ;;  %v110_v8 = vld [vmem:[%s209_s0 + $0x8] sm:$0x1]  }
   0x5   :  { %s139_s30 = smov 36   ;;  %s140_s2 = smov 32   ;;  %v111_v9 = vld [vmem:[%s209_s0 + $0x7] sm:$0x1]   ;;  %v112_v10 = vld [vmem:[%s209_s0 + $0x6] sm:$0x1]  }
   0x6   :  { %13 = vrot.lane.b32.xlu0 %v104_v2, %s135_s16  ;;  %25 = vrot.lane.b32.xlu1 %v106_v3, %s136_s17  ;;  %s141_s7 = smov 28   ;;  %s142_s8 = smov 24   ;;  %v113_v11 = vld [vmem:[%s209_s0 + $0x5] sm:$0x1]   ;;  %v114_v12 = vld [vmem:[%s209_s0 + $0x4] sm:$0x1]  }
   0x7   :  { %s143_s13 = smov 20   ;;  %s144_s14 = smov 16   ;;  %v115_v13 = vld [vmem:[%s209_s0 + $0x3] sm:$0x1]   ;;  %v116_v14 = vld [vmem:[%s209_s0 + $0x2] sm:$0x1]  }
   0x8   :  { %s145_s19 = smov 12   ;;  %s146_s20 = smov 8   ;;  %v117_v15 = vld [vmem:[%s209_s0 + $0x1] sm:$0x1]   ;;  %vm27_vm4 = vcmask 425344   ;;  %vm33_vm5 = vcmask 392544  }
   0x9   :  { %s147_s0 = smov 4   ;;  %vm39_vm6 = vcmask 359744   ;;  %vm45_vm7 = vcmask 326944   ;;  %vm51_vm8 = vcmask 294144   ;;  %vm57_vm9 = vcmask 261344  }
   0xa   :  { %31 = vrot.lane.b32.xlu0 %v107_v4, %s137_s24  ;;  %37 = vrot.lane.b32.xlu1 %v108_v5, %s138_s25  ;;  %vm63_vm10 = vcmask 228544   ;;  %vm69_vm11 = vcmask 195744   ;;  %vm75_vm12 = vcmask 162944   ;;  %vm81_vm13 = vcmask 130144  }
   0xb   :  { %vm87_vm14 = vcmask 97344   ;;  %vm93_vm15 = vcmask 64544  }
   0xe   :  { %43 = vrot.lane.b32.xlu0 %v109_v7, %s139_s30  ;;  %49 = vrot.lane.b32.xlu1 %v110_v8, %s140_s2 }
  0x12   :  { %55 = vrot.lane.b32.xlu0 %v111_v9, %s141_s7  ;;  %61 = vrot.lane.b32.xlu1 %v112_v10, %s142_s8 }
  0x16   :  { %67 = vrot.lane.b32.xlu0 %v113_v11, %s143_s13  ;;  %73 = vrot.lane.b32.xlu1 %v114_v12, %s144_s14 }
  0x1a   :  { %79 = vrot.lane.b32.xlu0 %v115_v13, %s145_s19  ;;  %85 = vrot.lane.b32.xlu1 %v116_v14, %s146_s20 }
  0x1e   :  { %91 = vrot.lane.b32.xlu0 %v117_v15, %s147_s0 }
  0x74   :  { %v8_v16 = vpop.permute.xlu0 %7   ;;  %v20_v17 = vpop.permute.xlu1 %19  }
  0x75   :  { %10 = vst.msk [vmem:[#allocation0] sm:$0x1] %vm9_vm1, %v8_v16  }
  0x78   :  { %v14_v18 = vpop.permute.xlu0 %13   ;;  %v26_v19 = vpop.permute.xlu1 %25  }
  0x79   :  { %16 = vst.msk [vmem:[#allocation0] sm:$0x1] %vm15_vm2, %v14_v18  }
  0x7a   :  { %22 = vst.msk [vmem:[#allocation0] sm:$0x1] %vm21_vm3, %v20_v17  }
  0x7b   :  { %28 = vst.msk [vmem:[#allocation0] sm:$0x1] %vm27_vm4, %v26_v19  }
  0x7c   :  { %v32_v20 = vpop.permute.xlu0 %31   ;;  %v38_v21 = vpop.permute.xlu1 %37  }
  0x7d   :  { %34 = vst.msk [vmem:[#allocation0] sm:$0x1] %vm33_vm5, %v32_v20  }
  0x7e   :  { %40 = vst.msk [vmem:[#allocation0] sm:$0x1] %vm39_vm6, %v38_v21  }
  0x80   :  { %v44_v22 = vpop.permute.xlu0 %43   ;;  %v50_v23 = vpop.permute.xlu1 %49  }
  0x81   :  { %46 = vst.msk [vmem:[#allocation0] sm:$0x1] %vm45_vm7, %v44_v22  }
  0x82   :  { %52 = vst.msk [vmem:[#allocation0] sm:$0x1] %vm51_vm8, %v50_v23  }
  0x84   :  { %v56_v24 = vpop.permute.xlu0 %55   ;;  %v62_v25 = vpop.permute.xlu1 %61  }
  0x85   :  { %58 = vst.msk [vmem:[#allocation0] sm:$0x1] %vm57_vm9, %v56_v24  }
  0x86   :  { %64 = vst.msk [vmem:[#allocation0] sm:$0x1] %vm63_vm10, %v62_v25  }
  0x88   :  { %v68_v26 = vpop.permute.xlu0 %67   ;;  %v74_v27 = vpop.permute.xlu1 %73  }
  0x89   :  { %70 = vst.msk [vmem:[#allocation0] sm:$0x1] %vm69_vm11, %v68_v26  }
  0x8a   :  { %76 = vst.msk [vmem:[#allocation0] sm:$0x1] %vm75_vm12, %v74_v27  }
  0x8c   :  { %v80_v28 = vpop.permute.xlu0 %79   ;;  %v86_v29 = vpop.permute.xlu1 %85  }
  0x8d   :  { %82 = vst.msk [vmem:[#allocation0] sm:$0x1] %vm81_vm13, %v80_v28  }
  0x8e   :  { %88 = vst.msk [vmem:[#allocation0] sm:$0x1] %vm87_vm14, %v86_v29  }
  0x90   :  { %v92_v30 = vpop.permute.xlu0 %91  }
  0x91   :  { %94 = vst.msk [vmem:[#allocation0] sm:$0x1] %vm93_vm15, %v92_v30  }
  0x98   :  { %v99_v31 = vld [vmem:[#allocation0] sm:$0x1] }
  0x99   :  { %102 = vst [vmem:[%s210_s1] sm:$0x1] %v99_v31 }

// kernel: residual_forward.4
= control target key start
LH: loop header
LB: loop body
LE: loop exit
PB: predicated region body
PF: predicated region fallthrough
CT: control target
= control target key end

     0   :  { %s904_s18 = smov 0   ;;  %s906_s19 = smov 0   ;;  %s1027_s0 = inlined_call_operand.vmem [shape: f32[2,16,64], index: 0, kind: input, shape index: {}]   ;;  %s1028_s1 = inlined_call_operand.vmem [shape: f32[1,64], index: 1, kind: input, shape index: {}]   ;;  %s1029_s2 = inlined_call_operand.vmem [shape: f32[1,64], index: 2, kind: input, shape index: {}]   ;;  %s1030_s3 = inlined_call_operand.vmem [shape: bf16[3,64,64], index: 3, kind: input, shape index: {}]   ;;  %s1031_s4 = inlined_call_operand.vmem [shape: f32[2,16,64], index: 4, kind: output, shape index: {0}]   ;;  %s1032_s5 = inlined_call_operand.vmem [shape: f32[2,2,64], index: 5, kind: output, shape index: {1}]  }
   0x1   :  { %s908_s20 = smov 0   ;;  %s910_s21 = smov 0  }
   0x2   :  { %s912_s22 = smov 0  }
   0x3 LB: > { %s25_s23 = sadd.s32 1, %s861_s20  ;;  %s28_s24 = sadd.s32 1, %s865_s21  ;;  %s869_s22 = sphi %s912_s22, %s16_s22   ;;  %s865_s21 = sphi %s910_s21, %s1036_s21   ;;  %s861_s20 = sphi %s908_s20, %s1035_s20   ;;  %s857_s19 = sphi %s906_s19, %s1034_s19   ;;  %s853_s18 = sphi %s904_s18, %s1033_s18  }
   0x4   : > { %p26_p0 = scmp.ge.s32.totalorder %s25_s23, 2  ;;  %p677_p1 = scmp.ge.s32.totalorder %s869_s22, 1 }
   0x5   : > { %p204_p2 = scmp.lt.s32.totalorder %s869_s22, 5 }
   0x6   : > { %s1038_s23 = smov (%p26_p0, %s25_s23), 0  ;;  %s1040_s24 = smov (!%p26_p0, %s28_s24), %s865_s21 }
   0x7   : > { %p205_p3 = pnand %p677_p1, %p204_p2  ;;  %p30_p4 = scmp.ge.s32.totalorder %s1040_s24, 2 }
   0x8   : > { %p239_p5 = scmp.lt.s32.totalorder (!%p205_p3), %s857_s19, 1  ;;  %p246_p6 = scmp.lt.s32.totalorder (!%p205_p3), %s853_s18, 1 }
   0x9   : > { %s1042_s24 = smov (%p30_p4, %s1040_s24), 0  ;;  %208 = sbr.rel (%p205_p3) target bundleno = 280 (0x118), region = 36 }
   0xa   : > { %p683_p7 = scmp.ne.s32.totalorder (!%p205_p3), %s853_s18, 0 }
   0xe   : > { %s1044_s19 = smov (!%p239_p5, %s857_s19), 1 }
   0xf   : > { %s247_s25 = scalar_select %p246_p6, %s853_s18, 1 }
  0x10   : > { %s724_s26 = sshll.u32 %s1044_s19, 4  ;;  %s680_s27 = sshll.u32 %s1044_s19, 1 }
  0x11   : > { %s243_s30 = scalar_lea.vmem %s1027_s0, %s724_s26  ;;  %s249_s6 = sadd.s32 %s680_s27, %s247_s25 }
  0x12   : > { %s681_s7 = sshll.u32 %s249_s6, 3  ;;  %s944_s10 = scalar_lea.vmem %s1032_s5, %s680_s27 }
  0x13   : > { %s949_s13 = scalar_lea.vmem %s1031_s4, %s681_s7  ;;  %260 = sbr.rel (%p683_p7) target bundleno = 33 (0x21), region = 40 }
  0x18   : > { %vm263_vm0 = vcmask 523264   ;;  %vm261_vm1 = vcmask 517120   ;;  %v267_v0 = vld [vmem:[%s243_s30] sm:$0xff]  ;;  %v871_v2 = vmov 0.0   ;;  %v268_v5 = vld [vmem:[%s243_s30 + $0x8] sm:$0xff] }
  0x19   : > { %v684_v1 = vld [vmem:[%s1028_s1] ss:$0 sm:$0xff]  ;;  %264 = vst.msk [vmem:[#allocation2] sm:$0xff] %vm263_vm0, %v871_v2  ;;  %265 = vst.msk [vmem:[#allocation2 + $0x8] sm:$0xff] %vm263_vm0, %v871_v2 }
  0x1a   : > { %266 = vst.msk [vmem:[#allocation2 + $0x10] sm:$0x3] %vm261_vm1, %v871_v2  ;;  %262 = vst.msk [vmem:[%s944_s10] sm:$0x3] %vm261_vm1, %v871_v2  ;;  %v276_v3 = vmul.f32 %v684_v1, %v267_v0  ;;  %v685_v4 = vld [vmem:[%s1029_s2] ss:$0 sm:$0xff]  ;;  %v277_v6 = vmul.f32 %v684_v1, %v268_v5 }
  0x1c   : > { %v285_v7 = vadd.f32 %v685_v4, %v276_v3  ;;  %v286_v8 = vadd.f32 %v685_v4, %v277_v6 }
  0x1e   : > { %v287_v9 = vmax.f32 %v285_v7, 0.0  ;;  %v288_v10 = vmax.f32 %v286_v8, 0.0 }
  0x20   : > { %289 = vst.msk [vmem:[#allocation2 + $0x1] sm:$0xff] %vm263_vm0, %v287_v9  ;;  %290 = vst.msk [vmem:[#allocation2 + $0x9] sm:$0xff] %vm263_vm0, %v288_v10 }
  0x21 PF: > { %v819_v11 = vld [vmem:[%s1030_s3 + $0x38] sm:$0xff]   ;;  %v872_v12 = vmov 0.0   ;;  %v821_v14 = vld [vmem:[%s1030_s3 + $0x30] sm:$0xff]   ;;  %vm873_vm2 = vmmov 0   ;;  %s686_s7 = sshll.u32 %s853_s18, 3  ;;  %v823_v16 = vld [vmem:[%s1030_s3 + $0x28] sm:$0xff]  }
  0x22   : > { %740 = vmatprep.subr.bf16.mxu0 %v872_v12  ;;  %752 = vmatprep.subr.bf16.mxu1 %v872_v12  ;;  %v820_v13 = vld [vmem:[%s1030_s3 + $0x18] sm:$0xff]   ;;  %v822_v15 = vld [vmem:[%s1030_s3 + $0x10] sm:$0xff]   ;;  %v824_v17 = vld [vmem:[%s1030_s3 + $0x8] sm:$0xff]   ;;  %s292_s17 = scalar_lea.vmem [#allocation2], %s686_s7  ;;  %vm340_vm3 = vcmask 523264   ;;  %vm549_vm4 = vcmask 1040384  }
  0x23   : > { %741 = vmatpush3.bf16.msra.mxu0 %v819_v11  ;;  %748 = vmatprep.mubr.msk.bf16.mxu0 %vm873_vm2, %v872_v12  ;;  %v825_v18 = vld [vmem:[%s1030_s3 + $0x20] sm:$0xff]   ;;  %v827_v24 = vld [vmem:[%s1030_s3 + $0x58] sm:$0xff]   ;;  %v828_v25 = vld [vmem:[%s1030_s3 + $0x50] sm:$0xff]   ;;  %vm552_vm5 = vcmask 517120  }
  0x24   : > { %753 = vmatpush3.bf16.msra.mxu1 %v820_v13  ;;  %742 = vmatprep.subr.bf16.mxu0 %v872_v12  ;;  %v826_v19 = vld [vmem:[%s1030_s3] sm:$0xff]   ;;  %v829_v26 = vld [vmem:[%s1030_s3 + $0x48] sm:$0xff]  }
  0x25   : > { %754 = vmatprep.subr.bf16.mxu1 %v872_v12  ;;  %760 = vmatprep.mubr.msk.bf16.mxu1 %vm873_vm2, %v872_v12  ;;  %v830_v27 = vld [vmem:[%s1030_s3 + $0x40] sm:$0xff]  }
  0x26   : > { %v548_v59 = vld [vmem:[%s944_s10] sm:$0x3] }
  0x27   : > { %743 = vmatpush3.bf16.msra.mxu0 %v821_v14  ;;  %v688_v20 = vld [vmem:[%s292_s17 + $0x1] sm:$0xff] }
  0x28   : > { %755 = vmatpush3.bf16.msra.mxu1 %v822_v15  ;;  %744 = vmatprep.subr.bf16.mxu0 %v872_v12  ;;  %v293_v21 = vld [vmem:[%s292_s17] sm:$0xff]  ;;  %v306_v22 = vpack.c.bf16 %v688_v20, %v688_v20 }
  0x29   : > { %756 = vmatprep.subr.bf16.mxu1 %v872_v12  ;;  %v294_v23 = vpack.c.bf16 %v293_v21, %v293_v21  ;;  %v708_v28 = vld [vmem:[%s292_s17 + $0x2] sm:$0xff] }
  0x2a   : > { %v454_v29 = vpack.c.bf16 %v708_v28, %v708_v28 }
  0x2b   : > { %745 = vmatpush3.bf16.msra.mxu0 %v823_v16 }
  0x2c   : > { %757 = vmatpush3.bf16.msra.mxu1 %v824_v17  ;;  %746 = vmatprep.subr.bf16.mxu0 %v872_v12 }
  0x2d   : > { %758 = vmatprep.subr.bf16.mxu1 %v872_v12 }
  0x2f   : > { %747 = vmatpush3.bf16.msra.mxu0 %v825_v18 }
  0x30   : > { %759 = vmatpush3.bf16.msra.mxu1 %v826_v19  ;;  %764 = vmatprep.subr.bf16.mxu0 %v872_v12 }
  0x32   : > { %749 = vmatmul.mubr.msk.bf16.vlgmr.msra.gmra.mxu0 %vm340_vm3, %v306_v22 }
  0x33   : > { %761 = vmatmul.mubr.msk.bf16.vlgmr.msra.gmra.mxu1 %vm340_vm3, %v294_v23  ;;  %765 = vmatpush3.bf16.msra.mxu0 %v827_v24 }
  0x34   : > { %766 = vmatprep.subr.bf16.mxu0 %v872_v12  ;;  %772 = vmatprep.mubr.msk.bf16.mxu0 %vm873_vm2, %v872_v12 }
  0x37   : > { %767 = vmatpush3.bf16.msra.mxu0 %v828_v25 }
  0x38   : > { %768 = vmatprep.subr.bf16.mxu0 %v872_v12 }
  0x3b   : > { %769 = vmatpush3.bf16.msra.mxu0 %v829_v26 }
  0x3c   : > { %770 = vmatprep.subr.bf16.mxu0 %v872_v12 }
  0x3f   : > { %771 = vmatpush3.bf16.msra.mxu0 %v830_v27 }
  0x42   : > { %773 = vmatmul.mubr.msk.bf16.vlgmr.msra.gmra.mxu0 %vm340_vm3, %v454_v29 }
  0xf2   : > { %v378_v30 = vpop.f32.mrf.mxu0 }
  0xf3   : > { %v445_v31 = vpop.f32.mrf.mxu1 }
  0xf4   : > { %v750_v32 = vpop.f32.mrf.mxu0  ;;  %v446_v38 = vadd.f32 %v445_v31, %v378_v30 }
  0xf5   : > { %v762_v33 = vpop.f32.mrf.mxu1 }
  0xf6   : > { %v381_v34 = vpop.f32.mrf.mxu0 }
  0xf7   : > { %v448_v35 = vpop.f32.mrf.mxu1 }
  0xf8   : > { %v751_v36 = vpop.f32.mrf.mxu0 }
  0xf9   : > { %v763_v37 = vpop.f32.mrf.mxu1 }
 0x102   : > { %v525_v39 = vpop.f32.mrf.mxu0 }
 0x103   : > { %v531_v40 = vadd.f32 %v525_v39, %v446_v38 }
 0x104   : > { %v774_v41 = vpop.f32.mrf.mxu0 }
 0x105   : > { %532 = vst.msk [vmem:[%s949_s13] sm:$0xff] %vm340_vm3, %v531_v40  ;;  %v533_v42 = vsel %vm340_vm3, %v531_v40, 0.0  ;;  %v540_v43 = vmul.f32 %v531_v40, %v531_v40 }
 0x106   : > { %v534_v44 = vrot.slane %v533_v42, 4  ;;  %v528_v45 = vpop.f32.mrf.mxu0 }
 0x107   : > { %v541_v46 = vsel %vm340_vm3, %v540_v43, 0.0 }
 0x108   : > { %v535_v47 = vadd.f32 %v534_v44, %v533_v42  ;;  %v542_v48 = vrot.slane %v541_v46, 4  ;;  %v775_v49 = vpop.f32.mrf.mxu0 }
 0x10a   : > { %v536_v50 = vrot.slane %v535_v47, 2  ;;  %v543_v51 = vadd.f32 %v542_v48, %v541_v46 }
 0x10c   : > { %v537_v52 = vadd.f32 %v536_v50, %v535_v47  ;;  %v544_v53 = vrot.slane %v543_v51, 2 }
 0x10e   : > { %v538_v54 = vrot.slane %v537_v52, 1  ;;  %v545_v55 = vadd.f32 %v544_v53, %v543_v51 }
 0x110   : > { %v546_v56 = vrot.slane %v545_v55, 1  ;;  %v539_v57 = vadd.f32 %v538_v54, %v537_v52 }
 0x112   : > { %v547_v58 = vadd.f32 %v546_v56, %v545_v55 }
 0x114   : > { %v550_v60 = vsel %vm549_vm4, %v539_v57, %v547_v58 }
 0x115   : > { %v551_v61 = vadd.f32 %v550_v60, %v548_v59 }
 0x117   : > { %553 = vst.msk [vmem:[%s944_s10] sm:$0x3] %vm552_vm5, %v551_v61 }
 0x118 PF: > { %s16_s22 = sadd.s32 1, %s869_s22   ;;  %s1033_s18 = smov %s861_s20 }
 0x119   : > { %p13_p8 = scmp.ge.s32.totalorder %s16_s22, 6   ;;  %s1034_s19 = smov %s865_s21 }
 0x11a   : > { %s1035_s20 = smov %s1038_s23  ;;  %s1036_s21 = smov %s1042_s24 }
 0x11b   :  { %15 = sbr.rel (!%p13_p8) target bundleno = 3 (0x3), region = 87 }

// kernel: residual_forward.5
= control target key start
LH: loop header
LB: loop body
LE: loop exit
PB: predicated region body
PF: predicated region fallthrough
CT: control target
= control target key end

     0   :  { %s497_s15 = smov 0   ;;  %s499_s16 = smov 0   ;;  %s562_s0 = inlined_call_operand.vmem [shape: f32[2,16,64], index: 0, kind: input, shape index: {}]   ;;  %s563_s1 = inlined_call_operand.vmem [shape: f32[1,64], index: 1, kind: input, shape index: {}]   ;;  %s564_s2 = inlined_call_operand.vmem [shape: f32[1,64], index: 2, kind: input, shape index: {}]   ;;  %s565_s3 = inlined_call_operand.vmem [shape: f32[2,18,64], index: 3, kind: input, shape index: {}]   ;;  %s566_s4 = inlined_call_operand.vmem [shape: f32[2,16,64], index: 4, kind: output, shape index: {}]  }
   0x1   :  { %s501_s17 = smov 0   ;;  %s503_s18 = smov 0  }
   0x2   :  { %s505_s19 = smov 0  }
   0x3 LB: > { %s23_s20 = sadd.s32 1, %s462_s17  ;;  %s26_s21 = sadd.s32 1, %s466_s18  ;;  %s470_s19 = sphi %s505_s19, %s14_s19   ;;  %s466_s18 = sphi %s503_s18, %s570_s18   ;;  %s462_s17 = sphi %s501_s17, %s569_s17   ;;  %s458_s16 = sphi %s499_s16, %s568_s16   ;;  %s454_s15 = sphi %s497_s15, %s567_s15  }
   0x4   : > { %p24_p0 = scmp.ge.s32.totalorder %s23_s20, 2  ;;  %p379_p1 = scmp.ge.s32.totalorder %s470_s19, 1 }
   0x5   : > { %p191_p2 = scmp.lt.s32.totalorder %s470_s19, 5 }
   0x6   : > { %s572_s20 = smov (%p24_p0, %s23_s20), 0  ;;  %s574_s21 = smov (!%p24_p0, %s26_s21), %s466_s18 }
   0x7   : > { %p192_p3 = pnand %p379_p1, %p191_p2  ;;  %p28_p4 = scmp.ge.s32.totalorder %s574_s21, 2 }
   0x8   : > { %p228_p5 = scmp.lt.s32.totalorder (!%p192_p3), %s458_s16, 1  ;;  %p230_p6 = scmp.lt.s32.totalorder (!%p192_p3), %s454_s15, 1 }
   0x9   : > { %s576_s21 = smov (%p28_p4, %s574_s21), 0  ;;  %195 = sbr.rel (%p192_p3) target bundleno = 30 (0x1e), region = 36 }
   0xa   : > { %s387_s26 = sshll.u32 (!%p192_p3), %s454_s15, 3 }
   0xe   : > { %s578_s16 = smov (!%p228_p5, %s458_s16), 1  ;;  %v385_v0 = vld [vmem:[%s563_s1] ss:$0 sm:$0xff]  ;;  %vm272_vm0 = vcmask 523264  }
   0xf   : > { %s231_s22 = scalar_select %p230_p6, %s454_s15, 1  ;;  %v386_v2 = vld [vmem:[%s564_s2] ss:$0 sm:$0xff] }
  0x10   : > { %s380_s23 = sshll.u32 %s578_s16, 1  ;;  %s391_s24 = smul.u32 24, %s578_s16 }
  0x11   : > { %s233_s25 = sadd.s32 %s380_s23, %s231_s22 }
  0x12   : > { %s381_s27 = sshll.u32 %s233_s25, 3  ;;  %s240_s30 = scalar_lea.vmem %s565_s3, %s391_s24 }
  0x13   : > { %s235_s9 = scalar_lea.vmem %s562_s0, %s381_s27  ;;  %s328_s12 = scalar_lea.vmem %s240_s30, %s387_s26 }
  0x14   : > { %v249_v1 = vld [vmem:[%s235_s9] sm:$0xff]  ;;  %s248_s15 = scalar_lea.vmem %s566_s4, %s381_s27 }
  0x15   : > { %v257_v3 = vmul.f32 %v385_v0, %v249_v1  ;;  %v388_v4 = vld [vmem:[%s328_s12 + $0x1] sm:$0xff] }
  0x17   : > { %v265_v5 = vadd.f32 %v386_v2, %v257_v3 }
  0x19   : > { %v270_v6 = vadd.f32 %v388_v4, %v265_v5 }
  0x1b   : > { %v271_v7 = vmax.f32 %v270_v6, 0.0 }
  0x1d   : > { %273 = vst.msk [vmem:[%s248_s15] sm:$0xff] %vm272_vm0, %v271_v7 }
  0x1e PF: > { %s14_s19 = sadd.s32 1, %s470_s19   ;;  %s567_s15 = smov %s462_s17 }
  0x1f   : > { %p11_p7 = scmp.ge.s32.totalorder %s14_s19, 6   ;;  %s568_s16 = smov %s466_s18 }
  0x20   : > { %s569_s17 = smov %s572_s20  ;;  %s570_s18 = smov %s576_s21 }
  0x21   :  { %13 = sbr.rel (!%p11_p7) target bundleno = 3 (0x3), region = 70 }

</bundles_post_ra>
